<compile_context>
chip_gen: v6e
topology: v6e:2x2x1
jax: 0.10.0
libtpu: 0.0.40
codegen_flags: <defaults>
</compile_context>

<pallas_src>
import functools

import jax
import jax.numpy as jnp
from jax import lax
from jax.experimental import pallas as pl
from jax.experimental.pallas import tpu as pltpu


# ---------------------------------------------------------------------------
# Kernels
# ---------------------------------------------------------------------------
def _stb_small_kernel(x_ref, out_ref, *, lane_in_block, thr, fold):
    """Fallback for B < 128: one tile, (B, 2) output (masked stores are fine)."""
    col = x_ref[:, lane_in_block:lane_in_block + 1].astype(jnp.float32)   # (B, 1)
    if fold:
        is_pos = (col > 0.0).astype(jnp.float32)
    else:
        is_pos = (jax.nn.sigmoid(col) > thr).astype(jnp.float32)
    out_ref[:, 0:1] = 1.0 - is_pos
    out_ref[:, 1:2] = is_pos


def _stb_lane_dense_kernel(x_ref, out_ref, stage_ref, *,
                           lane_in_block, thr, fold, lane_block):
    """Main path (B >= 128).

    x_ref:     (TB, lane_block) input-dtype tile containing the target column.
    out_ref:   (2, TB) f32; row 0 = is_neg, row 1 = is_pos, batch on lanes.
    stage_ref: (128, 128) f32 scratch, used only when lane_block < 128 so the
               in-kernel transpose is always the well-supported 128x128 case.
    """
    tb = x_ref.shape[0]
    n_chunks = tb // 128          # TB is a multiple of 128 by construction

    def body(c, carry):
        base = pl.multiple_of(c * 128, 128)
        chunk = x_ref[pl.ds(base, 128), :].astype(jnp.float32)    # (128, lane_block)
        if lane_block == 128:
            src = chunk
        else:
            stage_ref[:, 0:lane_block] = chunk
            src = stage_ref[...]
        # (128, 128) transpose on the XLU; keep only the target column as a
        # lane-dense (1, 128) row of batch entries.
        col_row = jnp.transpose(src, (1, 0))[lane_in_block:lane_in_block + 1, :]
        if fold:
            is_pos = (col_row > 0.0).astype(jnp.float32)
        else:
            is_pos = (jax.nn.sigmoid(col_row) > thr).astype(jnp.float32)
        out_ref[0:1, pl.ds(base, 128)] = 1.0 - is_pos
        out_ref[1:2, pl.ds(base, 128)] = is_pos
        return carry

    lax.fori_loop(0, n_chunks, body, 0)


# ---------------------------------------------------------------------------
# Wrapper
# ---------------------------------------------------------------------------
def single_to_binary(x, index: int, thr: float = 0.5, *, tb: int = 8192):
    """Pallas equivalent of SingleToBinary.forward for x of shape (B, N)."""
    B, N = x.shape
    if not (0 <= index < N):
        raise ValueError(f"index {index} out of range for N={N}")

    thr = float(thr)
    fold = (thr == 0.5)           # sigmoid(x) > 0.5  <=>  x > 0  (bit-exact)

    # Only DMA the 128-lane block that contains `index`.
    if N >= 128:
        lane_block = 128
        block_col = index // 128
        lane_in_block = index % 128
    else:
        lane_block = N
        block_col = 0
        lane_in_block = index

    itemsize = jnp.dtype(x.dtype).itemsize
    cost = pl.CostEstimate(
        flops=3 * B,
        transcendentals=0 if fold else B,
        bytes_accessed=B * lane_block * itemsize + B * 2 * 4,
    )

    # ---------------- small-batch fallback ----------------
    if B < 128:
        kernel = functools.partial(
            _stb_small_kernel, lane_in_block=lane_in_block, thr=thr, fold=fold)
        return pl.pallas_call(
            kernel,
            out_shape=jax.ShapeDtypeStruct((B, 2), jnp.float32),
            grid=(1,),
            in_specs=[pl.BlockSpec((B, lane_block), lambda i: (0, block_col))],
            out_specs=pl.BlockSpec((B, 2), lambda i: (0, 0)),
            cost_estimate=cost,
        )(x)

    # ---------------- lane-dense main path -----------------
    # Batch tile: multiple of 128, at most the requested `tb`, and capped at
    # ~ceil(B/2) so the grid has >= 2 tiles (v7x megacore sharding).
    tb = max(128, (int(tb) // 128) * 128)
    half = ((pl.cdiv(B, 2) + 127) // 128) * 128
    TB = min(tb, half)
    grid = (pl.cdiv(B, TB),)

    kernel = functools.partial(
        _stb_lane_dense_kernel,
        lane_in_block=lane_in_block, thr=thr, fold=fold, lane_block=lane_block)

    out_t = pl.pallas_call(
        kernel,
        out_shape=jax.ShapeDtypeStruct((2, B), jnp.float32),
        grid=grid,
        in_specs=[pl.BlockSpec((TB, lane_block), lambda i: (i, block_col))],
        out_specs=pl.BlockSpec((2, TB), lambda i: (0, i)),
        scratch_shapes=[pltpu.VMEM((128, 128), jnp.float32)],
        compiler_params=pltpu.CompilerParams(
            dimension_semantics=("parallel",),
        ),
        cost_estimate=cost,
    )(x)
    return jnp.transpose(out_t)   # (2, B) -> (B, 2), tiny XLA op


def single_to_binary_ref(x, index: int, thr: float = 0.5):
    """Pure-JAX reference for correctness checking."""
    is_pos = (jax.nn.sigmoid(x[:, index]) > thr).astype(jnp.float32)
    is_neg = 1.0 - is_pos
    return jnp.stack([is_neg, is_pos], axis=-1)


# ---------------------------------------------------------------------------
# Smoke tests
# ---------------------------------------------------------------------------
if __name__ == "__main__":
    key = jax.random.PRNGKey(0)
    k1, k2, k3, k4 = jax.random.split(key, 4)

    def _check(out, x, idx, thr):
        ref = single_to_binary_ref(x, idx, thr)
        assert out.shape == ref.shape, (out.shape, ref.shape)
        assert jnp.allclose(out, ref), (out, ref)
        assert jnp.allclose(out.sum(axis=-1), jnp.ones((x.shape[0],), jnp.float32))

    # Case 1: tiny module-like shape -> small-batch fallback path.
    x1 = jax.random.normal(k1, (8, 32), dtype=jnp.float32)
    o1 = jax.block_until_ready(single_to_binary(x1, 3, 0.5))
    _check(o1, x1, 3, 0.5)

    # Case 2: lane-dense path, index >= 128, multi-tile grid (TB=128, 3 tiles).
    x2 = jax.random.normal(k2, (384, 256), dtype=jnp.float32)
    o2 = jax.block_until_ready(single_to_binary(x2, 200, 0.5, tb=128))
    _check(o2, x2, 200, 0.5)

    # Case 3: lane-dense path with N < 128 (staging transpose) and a partial
    # last batch tile (B=300, TB=256 -> grid of 2).
    x3 = jax.random.normal(k3, (300, 64), dtype=jnp.float32)
    o3 = jax.block_until_ready(single_to_binary(x3, 20, 0.5, tb=256))
    _check(o3, x3, 20, 0.5)

    # Case 4: non-default threshold -> f32 sigmoid (EUP) path.
    x4 = jax.random.normal(k4, (256, 128), dtype=jnp.float32)
    o4 = jax.block_until_ready(single_to_binary(x4, 127, 0.7))
    _check(o4, x4, 127, 0.7)

    print("KERNEL_OK")
</pallas_src>

<mosaic_0001>
module attributes {stable_mosaic.version = 11 : i64} {
  func.func @_stb_small_kernel(%arg0: i32, %arg1: memref<8x32xf32, #tpu.memory_space<vmem>>, %arg2: memref<8x2xf32, #tpu.memory_space<vmem>>) attributes {dimension_semantics = [#tpu.dimension_semantics<arbitrary>], iteration_bounds = array<i64: 1>, scalar_prefetch = 0 : i64, scratch_operands = 0 : i64, tpu.core_type = #tpu.core_type<tc>, window_params = [{pipeline_mode = #tpu.pipeline_mode<synchronous>, transform_indices = @transform_0, window_bounds = array<i64: 8, 32>}, {pipeline_mode = #tpu.pipeline_mode<synchronous>, transform_indices = @transform_1, window_bounds = array<i64: 8, 2>}]} {
    %c0 = arith.constant 0 : index
    %c3 = arith.constant 3 : index
    %0 = vector.load %arg1[%c0, %c3] : memref<8x32xf32, #tpu.memory_space<vmem>>, vector<8x1xf32>
    %cst = arith.constant 0.000000e+00 : f32
    %1 = vector.broadcast %cst : f32 to vector<8x1xf32>
    %2 = arith.cmpf ogt, %0, %1 : vector<8x1xf32>
    %3 = arith.extui %2 : vector<8x1xi1> to vector<8x1xi32>
    %4 = arith.sitofp %3 : vector<8x1xi32> to vector<8x1xf32>
    %cst_0 = arith.constant 1.000000e+00 : f32
    %5 = vector.broadcast %cst_0 : f32 to vector<8x1xf32>
    %6 = arith.subf %5, %4 : vector<8x1xf32>
    %c0_1 = arith.constant 0 : index
    %c0_2 = arith.constant 0 : index
    %7 = vector.load %arg2[%c0_1, %c0_2] : memref<8x2xf32, #tpu.memory_space<vmem>>, vector<8x1xf32>
    tpu.vector_store %arg2[%c0_1, %c0_2], %6 {strides = array<i32>} : memref<8x2xf32, #tpu.memory_space<vmem>>, vector<8x1xf32>,
    %c0_3 = arith.constant 0 : index
    %c1 = arith.constant 1 : index
    %8 = vector.load %arg2[%c0_3, %c1] : memref<8x2xf32, #tpu.memory_space<vmem>>, vector<8x1xf32>
    tpu.vector_store %arg2[%c0_3, %c1], %4 {strides = array<i32>} : memref<8x2xf32, #tpu.memory_space<vmem>>, vector<8x1xf32>,
    return
  }
  func.func @transform_0(%arg0: i32) -> (i32, i32) {
    %c0_i32 = arith.constant 0 : i32
    %c0_i32_0 = arith.constant 0 : i32
    %c0_i32_1 = arith.constant 0 : i32
    return %c0_i32, %c0_i32_0 : i32, i32
  }
  func.func @transform_1(%arg0: i32) -> (i32, i32) {
    %c0_i32 = arith.constant 0 : i32
    %c0_i32_0 = arith.constant 0 : i32
    %c0_i32_1 = arith.constant 0 : i32
    return %c0_i32, %c0_i32_0 : i32, i32
  }
}

</mosaic_0001>

<bundles_post_ra>
// kernel: tpu_custom_call.1
= control target key start
LH: loop header
LB: loop body
LE: loop exit
PB: predicated region body
PF: predicated region fallthrough
CT: control target
= control target key end

     0   :  { %6 = vsyncpa [#allocation3], 0  ;;  %s69_s6 = smov [#allocation2]   ;;  %s92_s0 = inlined_call_operand.hbm [shape: f32[8,32], index: 0, kind: input, shape index: {}]   ;;  %s93_s1 = inlined_call_operand.vmem [shape: f32[8,2], index: 1, kind: output, shape index: {}]  }
   0x1   :  { %s13_s7 = sshll.u32 %s69_s6, 4  ;;  %s14_s7 = int_to_ptr.vmem [resolvable:$true] %s13_s7 }
   0x2   :  { %s55_s8 = scalar_lea.vmem %s14_s7, 128  ;;  %p60_p1 = scmp.lt.s32.totalorder %s14_s7, %s14_s7 }
   0x3   :  { %p56_p0 = scmp.ne.s32.totalorder %s14_s7, %s55_s8  ;;  %p61_p2 = scmp.lt.s32.totalorder %s55_s8, %s55_s8 }
   0x5   :  { %p62_p3 = por %p61_p2, %p60_p1 }
   0x7   :  { %p63_p4 = pnand %p62_p3, %p56_p0 }
   0x9   :  { %66 = shalt.err (!%p63_p4)
}
   0xa   :  { %16 = dma.hbm_to_vmem [thread:$0]  %s92_s0, 128, %s14_s7, [#allocation3]  }
   0xb   :  { %67 = dma.done.wait [#allocation3], 128  }
   0xc   :  { %68 = vsyncadd [#allocation3], 4294967168  ;;  %v20_v0 = vld [vmem:[#allocation2] sm:$0xff]  ;;  %v70_v1 = vmov 0.0   ;;  %s71_s11 = smov 125   ;;  %s72_s12 = smov 126  }
   0xd   :  { %vm21_vm0 = vcmp.gt.f32.partialorder %v20_v0, 0.0  ;;  %vm29_vm1 = vcmask 7168   ;;  %vm35_vm2 = vcmask 15368  }
   0xe   :  { %v42_v2 = vsel %vm21_vm0, 1.0, %v70_v1 }
   0xf   :  { %v24_v3 = vsub.f32 1.0, %v42_v2 }
  0x11   :  { %26 = vrot.lane.b32.xlu0 %v24_v3, %s71_s11 }
  0x15   :  { %32 = vrot.lane.b32.xlu0 %v42_v2, %s72_s12 }
  0x83   :  { %v27_v4 = vpop.permute.xlu0 %26 }
  0x84   :  { %30 = vst.msk [vmem:[%s93_s1] sm:$0xff] %vm29_vm1, %v27_v4 }
  0x87   :  { %v33_v5 = vpop.permute.xlu0 %32 }
  0x88   :  { %36 = vst.msk [vmem:[%s93_s1] sm:$0xff] %vm35_vm2, %v33_v5 }
  0x89   :  { %41 = vsyncpa [#allocation3], 1 }

</bundles_post_ra>
